<compile_context>
chip_gen: v7x
topology: tpu7x:2x2x1
jax: 0.10.0
libtpu: 0.0.40
codegen_flags: <defaults>
</compile_context>

<pallas_src>
import jax
import jax.numpy as jnp
from jax.experimental import pallas as pl
from jax.experimental.pallas import tpu as pltpu


# ---- CFG (matches the PyTorch module defaults) ------------------------------
NB_CATEGORIES = 2
CATEGORY_EMBEDDING = 768

_DEFAULT_TOKEN_TILE = 2048  # multiple of 8; 2048*768*4B = 6 MB out block (x2 buffers)


# ---- Pallas kernel -----------------------------------------------------------
def _embedding_select_kernel(idx_ref, table_ref, out_ref):
    """idx_ref: (TT, 1) int32; table_ref: (C, D) VMEM-resident; out_ref: (TT, D)."""
    nb = table_ref.shape[0]
    idx = idx_ref[...]  # (TT, 1)

    if nb == 1:
        # Implicit (TT,1) x (1,D) broadcast inside the select — no materialized temp.
        out = jnp.where(idx >= 0, table_ref[0, :][None, :], jnp.zeros((), table_ref.dtype))
    else:
        # VPU select chain over the (static, tiny) category count. Out-of-range indices
        # fall back to row 0 (indices are clamped in the wrapper anyway).
        out = table_ref[0, :][None, :]  # (1, D); broadcasts lazily inside the selects
        for c in range(1, nb):
            out = jnp.where(idx == c, table_ref[c, :][None, :], out)

    out_ref[...] = out.astype(out_ref.dtype)


def _round_up(x, m):
    return ((x + m - 1) // m) * m


def category_encoder_forward(indices, embedding_table, *, token_tile=_DEFAULT_TOKEN_TILE):
    """Equivalent of CategoryEncoder.forward: nn.Embedding lookup.

    indices: integer array of arbitrary shape, values in [0, nb_categories)
    embedding_table: float [nb_categories, embed_dim]
    returns: indices.shape + (embed_dim,) in embedding_table.dtype
    """
    orig_shape = indices.shape
    nb_categories, embed_dim = embedding_table.shape
    out_dtype = embedding_table.dtype

    # Flatten tokens; clamp to valid range (PyTorch would raise on OOB — we clamp).
    idx_flat = jnp.clip(indices.reshape(-1).astype(jnp.int32), 0, nb_categories - 1)
    n_tok = idx_flat.shape[0]

    if n_tok == 0:  # degenerate input: no pallas_call with a zero-size grid
        return jnp.zeros(orig_shape + (embed_dim,), dtype=out_dtype)

    # Block size: multiple of 8 (sublane) or equal to the full token dim.
    # Aim for >= 2 grid steps when possible so the parallel axis shards across
    # v7x's 2 TensorCores; cap at token_tile for VMEM / roofline amortization.
    if n_tok <= 8:
        block_t = n_tok
    else:
        n_tok8 = _round_up(n_tok, 8)
        block_t = min(token_tile, _round_up(pl.cdiv(n_tok8, 2), 8))
    grid = (pl.cdiv(n_tok, block_t),)  # ragged final block (if any) is masked by Pallas

    idx_2d = idx_flat.reshape(n_tok, 1)

    itemsize = jnp.dtype(out_dtype).itemsize
    cost = pl.CostEstimate(
        flops=n_tok * embed_dim,  # ~1 select per output element
        transcendentals=0,
        bytes_accessed=n_tok * embed_dim * itemsize          # output writeback
        + n_tok * 4                                          # indices
        + nb_categories * embed_dim * itemsize,              # table (resident)
    )

    grid_spec = pltpu.PrefetchScalarGridSpec(
        num_scalar_prefetch=0,
        grid=grid,
        in_specs=[
            # Per-block token indices, streamed to VMEM.
            pl.BlockSpec((block_t, 1), lambda i: (i, 0)),
            # Full embedding table, constant index_map -> DMA'd once, resident in VMEM.
            pl.BlockSpec((nb_categories, embed_dim), lambda i: (0, 0)),
        ],
        out_specs=pl.BlockSpec((block_t, embed_dim), lambda i: (i, 0)),
    )

    out_flat = pl.pallas_call(
        _embedding_select_kernel,
        grid_spec=grid_spec,
        out_shape=jax.ShapeDtypeStruct((n_tok, embed_dim), out_dtype),
        compiler_params=pltpu.CompilerParams(
            dimension_semantics=("parallel",),
        ),
        cost_estimate=cost,
    )(idx_2d, embedding_table)

    # No slice needed: out_flat is exactly (n_tok, D); reshape is metadata-only.
    return out_flat.reshape(orig_shape + (embed_dim,))


# ---- Parameter init (deterministic, mirrors nn.Embedding default N(0,1)) ----
def init_category_encoder_params(key, nb_categories=NB_CATEGORIES,
                                 embed_dim=CATEGORY_EMBEDDING):
    weight = jax.random.normal(key, (nb_categories, embed_dim), dtype=jnp.float32)
    return weight


if __name__ == "__main__":
    key = jax.random.PRNGKey(0)
    k_w, k_idx = jax.random.split(key)

    # Embedding table: (nb_categories=2, category_embedding=768)
    emb_weight = init_category_encoder_params(k_w)

    # Example input: batch=2, seq=8 category indices in [0, nb_categories)
    indices = jax.random.randint(k_idx, (2, 8), 0, NB_CATEGORIES, dtype=jnp.int32)

    out = category_encoder_forward(indices, emb_weight)
    out = jax.block_until_ready(out)

    # Reference check (plain JAX gather == nn.Embedding semantics)
    ref = emb_weight[indices]
    assert out.shape == (2, 8, CATEGORY_EMBEDDING), out.shape
    assert jnp.allclose(out, ref), "mismatch vs reference embedding lookup"

    print("KERNEL_OK")
</pallas_src>

<mosaic_0001>
module attributes {stable_mosaic.version = 11 : i64} {
  func.func @_embedding_select_kernel(%arg0: i32, %arg1: memref<8x1xi32, #tpu.memory_space<vmem>>, %arg2: memref<2x768xf32, #tpu.memory_space<vmem>>, %arg3: memref<8x768xf32, #tpu.memory_space<vmem>>) attributes {dimension_semantics = [#tpu.dimension_semantics<parallel>], iteration_bounds = array<i64: 2>, scalar_prefetch = 0 : i64, scratch_operands = 0 : i64, tpu.core_type = #tpu.core_type<tc>, window_params = [{transform_indices = @transform_0, window_bounds = array<i64: 8, 1>}, {pipeline_mode = #tpu.pipeline_mode<synchronous>, transform_indices = @transform_1, window_bounds = array<i64: 2, 768>}, {transform_indices = @transform_2, window_bounds = array<i64: 8, 768>}]} {
    %c0 = arith.constant 0 : index
    %c0_0 = arith.constant 0 : index
    %0 = vector.load %arg1[%c0, %c0_0] : memref<8x1xi32, #tpu.memory_space<vmem>>, vector<8x1xi32>
    %c0_1 = arith.constant 0 : index
    %c0_2 = arith.constant 0 : index
    %1 = vector.load %arg2[%c0_1, %c0_2] : memref<2x768xf32, #tpu.memory_space<vmem>>, vector<1x768xf32>
    %2 = vector.shape_cast %1 : vector<1x768xf32> to vector<768xf32>
    %3 = vector.shape_cast %2 : vector<768xf32> to vector<1x768xf32>
    %c1_i32 = arith.constant 1 : i32
    %4 = vector.broadcast %c1_i32 : i32 to vector<8x1xi32>
    %5 = arith.cmpi eq, %0, %4 : vector<8x1xi32>
    %c1 = arith.constant 1 : index
    %c0_3 = arith.constant 0 : index
    %6 = vector.load %arg2[%c1, %c0_3] : memref<2x768xf32, #tpu.memory_space<vmem>>, vector<1x768xf32>
    %7 = vector.shape_cast %6 : vector<1x768xf32> to vector<768xf32>
    %8 = vector.shape_cast %7 : vector<768xf32> to vector<1x768xf32>
    %9 = vector.shape_cast %5 : vector<8x1xi1> to vector<8x1xi1>
    %10 = vector.broadcast %9 : vector<8x1xi1> to vector<8x768xi1>
    %11 = vector.shape_cast %8 : vector<1x768xf32> to vector<1x768xf32>
    %12 = vector.broadcast %11 : vector<1x768xf32> to vector<8x768xf32>
    %13 = vector.shape_cast %3 : vector<1x768xf32> to vector<1x768xf32>
    %14 = vector.broadcast %13 : vector<1x768xf32> to vector<8x768xf32>
    %15 = arith.select %10, %12, %14 : vector<8x768xi1>, vector<8x768xf32>
    %c0_4 = arith.constant 0 : index
    %c0_5 = arith.constant 0 : index
    %16 = vector.load %arg3[%c0_4, %c0_5] : memref<8x768xf32, #tpu.memory_space<vmem>>, vector<8x768xf32>
    tpu.vector_store %arg3[%c0_4, %c0_5], %15 {strides = array<i32>} : memref<8x768xf32, #tpu.memory_space<vmem>>, vector<8x768xf32>,
    return
  }
  func.func @transform_0(%arg0: i32) -> (i32, i32) {
    %c0_i32 = arith.constant 0 : i32
    %c0_i32_0 = arith.constant 0 : i32
    return %arg0, %c0_i32 : i32, i32
  }
  func.func @transform_1(%arg0: i32) -> (i32, i32) {
    %c0_i32 = arith.constant 0 : i32
    %c0_i32_0 = arith.constant 0 : i32
    %c0_i32_1 = arith.constant 0 : i32
    return %c0_i32, %c0_i32_0 : i32, i32
  }
  func.func @transform_2(%arg0: i32) -> (i32, i32) {
    %c0_i32 = arith.constant 0 : i32
    %c0_i32_0 = arith.constant 0 : i32
    return %arg0, %c0_i32 : i32, i32
  }
}

</mosaic_0001>

<bundles_post_ra>
// kernel: tpu_custom_call.1
= control target key start
LH: loop header
LB: loop body
LE: loop exit
PB: predicated region body
PF: predicated region fallthrough
CT: control target
= control target key end

     0   :  { %7 = vsyncpa [#allocation3], 0  ;;  %s540_s0 = inlined_call_operand.vmem [shape: s32[16,1], index: 0, kind: input, shape index: {}]   ;;  %s541_s1 = inlined_call_operand.vmem [shape: f32[2,768], index: 1, kind: input, shape index: {}]   ;;  %s542_s2 = inlined_call_operand.hbm [shape: f32[16,768], index: 2, kind: output, shape index: {}]  }
   0x1   :  { %9 = vsyncpa [#allocation3 + $0x1], 0  ;;  %s430_s9 = smov 0   ;;  %s432_s10 = smov 0  }
   0x2   :  { %s434_s11 = smov 0   ;;  %s436_s12 = smov 0  }
   0x3 LB: > { %s451_s13 = sadd.s32 4294967295, %s411_s12   ;;  %s297_s14 = sadd.s32 4294967294, %s411_s12   ;;  %s411_s12 = sphi %s436_s12, %s548_s12   ;;  %s407_s11 = sphi %s434_s11, %s547_s11   ;;  %s403_s10 = sphi %s432_s10, %s546_s10   ;;  %s399_s9 = sphi %s430_s9, %s545_s9  }
   0x4   : > { %s455_s15 = sadd.s32 1, %s411_s12   ;;  %s69_s16 = sadd.s32 1, %s407_s11 }
   0x5   : > { %s66_s17 = ssub.s32 %s411_s12, %s455_s15  ;;  %p79_p0 = scmp.ne.s32.totalorder %s407_s11, %s403_s10 }
   0x6   : > { %p67_p1 = scmp.eq.s32.totalorder %s66_s17, 0  ;;  %p80_p2 = scmp.eq.s32.totalorder %s451_s13, 1 }
   0x7   : > { %p85_p3 = scmp.ne.s32.totalorder %s403_s10, %s399_s9  ;;  %p86_p4 = scmp.eq.s32.totalorder %s297_s14, 1 }
   0x8   : > { %s466_s18 = scalar_select %p67_p1, %s407_s11, %s69_s16  }
   0x9   : > { %p468_p5 = por %p80_p2, %p79_p0  ;;  %p472_p6 = por %p86_p4, %p85_p3 }
   0xa   : > { %p300_p7 = scmp.ge.s32.totalorder %s411_s12, 1  ;;  %p114_p8 = scmp.lt.s32.totalorder %s411_s12, 3 }
   0xc   : > { %p115_p9 = pnand %p300_p7, %p114_p8 }
   0xd   : > { %p135_p10 = scmp.lt.s32.totalorder (!%p115_p9), %s451_s13, 1  ;;  %v413_v0 = vmov (!%p115_p9), 0   ;;  %v150_v3 = vlaneseq (!%p115_p9)  ;;  %s132_s26 = sand.u32 (!%p115_p9), 1, %s403_s10   ;;  %v302_v9 = vld [vmem:[%s541_s1 + $0x1] ss:$2 sm:$0x3f] (!%p115_p9) }
   0xe   : > { %118 = sbr.rel (%p115_p9) target bundleno = 174 (0xae), region = 28  ;;  %348 = vset.pattern.permute.xlu0 (!%p115_p9), %v413_v0  ;;  %v140_v10 = vld [vmem:[%s541_s1] ss:$2 sm:$0x3f] (!%p115_p9)  ;;  %s414_s17 = smov (!%p115_p9), [#allocation2]  }
   0xf   : > { %v151_v4 = vshrl.u32 (!%p115_p9), %v150_v3, 7  ;;  %s306_s27 = smul.u32 (!%p115_p9), 48, %s132_s26 }
  0x10   : > { %s307_s4 = smul.u32 (!%p115_p9), 768, %s451_s13 }
  0x11   : > { %v152_v5 = vsub.s32 (!%p115_p9), 0, %v151_v4  ;;  %v156_v6 = vsub.s32 (!%p115_p9), 1, %v151_v4  ;;  %v160_v7 = vsub.s32 (!%p115_p9), 2, %v151_v4  ;;  %v164_v8 = vsub.s32 (!%p115_p9), 3, %v151_v4  ;;  %s134_s5 = scalar_lea.vmem (!%p115_p9), [#allocation2], %s306_s27 }
  0x12   : > { %v168_v11 = vsub.s32 (!%p115_p9), 4, %v151_v4  ;;  %v172_v12 = vsub.s32 (!%p115_p9), 5, %v151_v4  ;;  %s238_s6 = sshll.u32 (!%p115_p9), %s134_s5, 4  ;;  %s496_s14 = scalar_lea.hbm (!%p115_p9), %s542_s2, %s307_s4  ;;  %s498_s6 = int_to_ptr.vmem [resolvable:$true] %s238_s6 }
  0x13   : > { %v153_v13 = vrot.slane (!%p115_p9), %v302_v9, %v152_v5  ;;  %v157_v14 = vrot.slane (!%p115_p9), %v302_v9, %v156_v6  ;;  %v161_v15 = vrot.slane (!%p115_p9), %v302_v9, %v160_v7  ;;  %v165_v16 = vrot.slane (!%p115_p9), %v302_v9, %v164_v8  ;;  %s349_s16 = scalar_lea.vmem (!%p115_p9), %s498_s6, 768 }
  0x14   : > { %v184_v17 = vrot.slane (!%p115_p9), %v140_v10, %v152_v5  ;;  %v188_v18 = vrot.slane (!%p115_p9), %v140_v10, %v156_v6  ;;  %v192_v19 = vrot.slane (!%p115_p9), %v140_v10, %v160_v7  ;;  %v196_v20 = vrot.slane (!%p115_p9), %v140_v10, %v164_v8  ;;  %p350_p11 = scmp.ne.s32.totalorder (!%p115_p9), %s498_s6, %s349_s16 }
  0x15   : > { %s136_s21 = scalar_select %p135_p10, %s451_s13, 1  ;;  %v169_v21 = vrot.slane %v302_v9, %v168_v11  ;;  %v173_v22 = vrot.slane %v302_v9, %v172_v12  ;;  %v200_v23 = vrot.slane %v140_v10, %v168_v11  ;;  %v204_v24 = vrot.slane %v140_v10, %v172_v12 }
  0x16   : > { %s224_s13 = scalar_lea.sflag [#allocation3], %s132_s26  ;;  %p351_p12 = pnand %p350_p11, %p468_p5 }
  0x17   : > { %s301_s22 = sshll.u32 %s136_s21, 3  ;;  %s353_s21 = sshll.u32 %s414_s17, 4  ;;  %s354_s21 = int_to_ptr.vmem [resolvable:$false] %s353_s21 }
  0x18   : > { %s138_s25 = scalar_lea.vmem %s540_s0, %s301_s22  ;;  %p352_p13 = pneg %p351_p12 }
  0x19   : > { %v139_v1 = vld [vmem:[%s138_s25] sm:$0xff]  ;;  %s355_s22 = scalar_lea.vmem %s354_s21, 1536  ;;  %p356_p0 = scmp.lt.s32.totalorder %s498_s6, %s354_s21 }
  0x1a   : > { %vm141_vm0 = vcmp.eq.s32.totalorder %v139_v1, 1  ;;  %p357_p1 = scmp.lt.s32.totalorder %s355_s22, %s349_s16 }
  0x1b   : > { %v144_v2 = vsel %vm141_vm0, 1, %v413_v0 }
  0x1c   : > { %146 = vperm.xlu0 %348, %v144_v2   ;;  %p358_p2 = por %p357_p1, %p356_p0 }
  0x1e   : > { %p359_p3 = pnand %p358_p2, %p352_p13 }
  0x9b   : > { %v147_v25 = vpop.permute.xlu0 %146 }
  0x9c   : > { %vm148_vm1 = vcmp.eq.s32.totalorder %v147_v25, 1 }
  0x9d   : > { %v211_v26 = vsel %vm148_vm1, %v153_v13, %v184_v17  ;;  %v212_v27 = vsel %vm148_vm1, %v157_v14, %v188_v18  ;;  %v213_v28 = vsel %vm148_vm1, %v161_v15, %v192_v19  ;;  %v214_v29 = vsel %vm148_vm1, %v165_v16, %v196_v20 }
  0x9e   : > { %v215_v30 = vsel %vm148_vm1, %v169_v21, %v200_v23  ;;  %v216_v31 = vsel %vm148_vm1, %v173_v22, %v204_v24  ;;  %217 = vst [vmem:[%s134_s5] sm:$0xff] %v211_v26  ;;  %218 = vst [vmem:[%s134_s5 + $0x8] sm:$0xff] %v212_v27 }
  0x9f   : > { %219 = vst [vmem:[%s134_s5 + $0x10] sm:$0xff] %v213_v28  ;;  %220 = vst [vmem:[%s134_s5 + $0x18] sm:$0xff] %v214_v29 }
  0xa0   : > { %221 = vst [vmem:[%s134_s5 + $0x20] sm:$0xff] %v215_v30  ;;  %222 = vst [vmem:[%s134_s5 + $0x28] sm:$0xff] %v216_v31 }
  0xa1   : > { %362 = shalt.err (!%p359_p3)
}
  0xa2   : > { %s363_s23 = scalar_lea.hbm %s496_s14, 768  ;;  %s367_s26 = scalar_lea.hbm %s542_s2, 1536 }
  0xa3   : > { %p364_p4 = scmp.ne.s32.totalorder %s496_s14, %s363_s23  ;;  %p368_p9 = scmp.lt.u32.totalorder %s496_s14, %s542_s2 }
  0xa4   : > { %p369_p10 = scmp.lt.u32.totalorder %s367_s26, %s363_s23  ;;  %p371_p12 = scmp.lt.u32.totalorder %s363_s23, %s496_s14 }
  0xa5   : > { %p365_p7 = pnand %p364_p4, %p468_p5 }
  0xa6   : > { %p370_p11 = por %p369_p10, %p368_p9 }
  0xa7   : > { %p366_p8 = pneg %p365_p7 }
  0xa8   : > { %p372_p13 = por %p371_p12, %p370_p11 }
  0xaa   : > { %p373_p0 = pnand %p372_p13, %p366_p8 }
  0xac   : > { %376 = shalt.err (!%p373_p0)
}
  0xad   : > { %308 = dma.vmem_to_hbm [thread:$0]  (%p468_p5), %s498_s6, 768, %s496_s14, %s224_s13  }
  0xae PF: > { %p314_p1 = scmp.ge.s32.totalorder %s411_s12, 2  ;;  %s250_s29 = sand.u32 1, %s399_s9  }
  0xaf   : > { %s251_s30 = scalar_lea.sflag [#allocation3], %s250_s29 }
  0xb0   : > { %p311_p2 = pnand %p314_p1, %p472_p6 }
  0xb2   : > { %394 = dma.done.wait (!%p311_p2), %s251_s30, 768  }
  0xb3   : > { %396 = vsyncadd (!%p311_p2), %s251_s30, 4294966528  ;;  %p12_p3 = scmp.ge.s32.totalorder %s455_s15, 4   ;;  %s545_s9 = smov %s403_s10 }
  0xb4   : > { %s546_s10 = smov %s407_s11  ;;  %s547_s11 = smov %s466_s18 }
  0xb5   : > { %s548_s12 = smov %s455_s15  ;;  %14 = sbr.rel (!%p12_p3) target bundleno = 3 (0x3), region = 64 }
  0xbc   :  { %256 = vsyncpa [#allocation3], 1 }
  0xbd   :  { %258 = vsyncpa [#allocation3 + $0x1], 1 }

</bundles_post_ra>
